<compile_context>
chip_gen: v7x
topology: tpu7x:2x2x1
jax: 0.10.0
libtpu: 0.0.40
codegen_flags: <defaults>
</compile_context>

<pallas_src>
import functools

import jax
import jax.numpy as jnp
from jax.experimental import pallas as pl
from jax.experimental.pallas import tpu as pltpu


# ----------------------------------------------------------------------------
# Kernels
# ----------------------------------------------------------------------------
def decoder_resident_kernel(x_ref, w1_ref, b1_ref, w2_ref, b2_ref, o_ref):
    """Weights fully VMEM-resident; grid = (batch tiles,)."""
    h = jnp.dot(x_ref[...], w1_ref[...], preferred_element_type=jnp.float32)
    h = jnp.maximum(h + b1_ref[...], 0.0)
    o = jnp.dot(h.astype(w2_ref.dtype), w2_ref[...],
                preferred_element_type=jnp.float32)
    o_ref[...] = (o + b2_ref[...]).astype(o_ref.dtype)


def decoder_streamed_kernel(x_ref, w1_ref, b1_ref, w2_ref, b2_ref, o_ref,
                            *scratch, tk):
    """Grid = (batch tiles, out-col tiles, hidden/K tiles); K innermost.

    If no scratch is given the output dtype is f32 and we accumulate directly
    into o_ref (output block index is constant across the K axis).
    """
    k = pl.program_id(2)
    acc_ref = scratch[0] if scratch else o_ref

    @pl.when(k == 0)
    def _init():
        acc_ref[...] = jnp.broadcast_to(
            b2_ref[...].astype(jnp.float32), acc_ref.shape)

    # Slice the resident b1 for this hidden chunk (no per-step bias DMA).
    if tk == b1_ref.shape[1]:
        b1_tile = b1_ref[...]
    else:
        start = k * tk
        if tk % 128 == 0:
            start = pl.multiple_of(start, 128)
        b1_tile = b1_ref[:, pl.ds(start, tk)]

    # First linear: (block_b, in_size) @ (in_size, tk), f32 accumulation.
    h = jnp.dot(x_ref[...], w1_ref[...], preferred_element_type=jnp.float32)
    h = jnp.maximum(h + b1_tile, 0.0)

    # Second linear: accumulate this hidden chunk's contribution (f32).
    acc_ref[...] += jnp.dot(h.astype(w2_ref.dtype), w2_ref[...],
                            preferred_element_type=jnp.float32)

    if scratch:
        @pl.when(k == pl.num_programs(2) - 1)
        def _finalize():
            o_ref[...] = acc_ref[...].astype(o_ref.dtype)


# ----------------------------------------------------------------------------
# Helpers
# ----------------------------------------------------------------------------
def _round_up(x, m):
    return ((x + m - 1) // m) * m


def _vmem_budget_bytes():
    """~85% of physical VMEM per TensorCore (conservative fallback: 64 MiB)."""
    cap = 64 * 1024 * 1024
    try:
        info = pltpu.get_tpu_info()
        cap = int(getattr(info, "vmem_capacity_bytes", cap))
    except Exception:
        pass
    return int(cap * 0.85)


def _choose_config(B, in_size, out_pad, x_itemsize, out_itemsize, budget):
    """Pick (resident?, block_b, tk, tn) so the working set fits `budget`."""
    b_cap = max(8, min(1024, _round_up(B, 8)))
    bb_candidates = [c for c in (1024, 512, 384, 256, 128, 64, 32, 16, 8)
                     if c <= b_cap] or [8]

    # ---- Fast path: weights fully VMEM-resident ----------------------------
    w_resident = (in_size * in_size * 2       # W1 bf16
                  + in_size * out_pad * 2     # W2 bf16
                  + in_size * 4               # b1 f32
                  + out_pad * 4)              # b2 f32

    def resident_est(bb):
        return (w_resident
                + 2 * bb * in_size * x_itemsize      # x tile (double-buffered)
                + 2 * bb * out_pad * out_itemsize    # out tile (double-buffered)
                + bb * in_size * (4 + 2)             # h f32 + bf16 cast
                + bb * out_pad * 4)                  # f32 matmul result

    for bb in bb_candidates:
        if resident_est(bb) <= budget:
            return dict(resident=True, block_b=bb, tk=in_size, tn=out_pad,
                        est_bytes=resident_est(bb))

    # ---- Streamed path: K-tile the hidden dim, N-tile the output columns ---
    tn_cands = [c for c in (2048, 1024, 512, 256, 128)
                if c <= out_pad and out_pad % c == 0] or [out_pad]
    tk_cands = [c for c in (2048, 1024, 512, 256, 128)
                if c <= in_size and in_size % c == 0] or [in_size]

    def streamed_est(bb, tk, tn):
        return (2 * bb * in_size * x_itemsize   # x tile (resident per batch tile)
                + 2 * in_size * tk * 2          # W1 column tile bf16
                + 2 * tk * tn * 2               # W2 row tile bf16
                + in_size * 4                   # b1 resident f32
                + 2 * tn * 4                    # b2 tile f32
                + 2 * bb * tn * out_itemsize    # out tile
                + bb * tn * 4                   # f32 accumulator / dot result
                + bb * tk * (4 + 2))            # h f32 + bf16 cast

    tk_min, tn_min = tk_cands[-1], tn_cands[-1]
    block_b = next((bb for bb in bb_candidates
                    if streamed_est(bb, tk_min, tn_min) <= budget),
                   bb_candidates[-1])
    tn = next((t for t in tn_cands
               if streamed_est(block_b, tk_min, t) <= budget), tn_min)
    tk = next((t for t in tk_cands
               if streamed_est(block_b, t, tn) <= budget), tk_min)
    return dict(resident=False, block_b=block_b, tk=tk, tn=tn,
                est_bytes=streamed_est(block_b, tk, tn))


# ----------------------------------------------------------------------------
# Wrapper
# ----------------------------------------------------------------------------
def prepare_decoder_params(w1, b1, w2, b2):
    """One-time prep: pad out_size to a lane-dense multiple of 128 and cast
    weights to bf16 / biases to f32 (kept out of the per-call hot path)."""
    in_size = w1.shape[0]
    out_size = w2.shape[1]
    out_pad = _round_up(out_size, 128)
    b1 = jnp.asarray(b1).reshape(1, -1)
    b2 = jnp.asarray(b2).reshape(1, -1)
    if out_pad != out_size:
        w2 = jnp.pad(w2, ((0, 0), (0, out_pad - out_size)))
        b2 = jnp.pad(b2, ((0, 0), (0, out_pad - out_size)))
    return dict(
        w1=w1.astype(jnp.bfloat16),
        b1=b1.astype(jnp.float32),
        w2=w2.astype(jnp.bfloat16),
        b2=b2.astype(jnp.float32),
        in_size=in_size,
        out_size=out_size,
        out_pad=out_pad,
    )


def decoder_forward(x, params, *, vmem_budget_override=None):
    """x: (B, in_size) -> (B, out_size), equivalent to
    relu(x @ W1 + b1) @ W2 + b2 (bf16 MXU operands, f32 accumulation)."""
    B, in_size = x.shape
    assert in_size == params["in_size"]
    out_size, out_pad = params["out_size"], params["out_pad"]
    out_dtype = x.dtype
    out_itemsize = jnp.dtype(out_dtype).itemsize

    hw_budget = _vmem_budget_bytes()
    budget = hw_budget if vmem_budget_override is None else int(vmem_budget_override)
    cfg = _choose_config(B, in_size, out_pad, 2, out_itemsize, budget)
    block_b = cfg["block_b"]

    b_pad = _round_up(B, block_b)
    x_p = x if b_pad == B else jnp.pad(x, ((0, b_pad - B), (0, 0)))
    x_bf = x_p.astype(jnp.bfloat16)

    n_bt = b_pad // block_b
    vmem_limit = int(min(hw_budget,
                         max(cfg["est_bytes"] + 4 * 1024 * 1024,
                             8 * 1024 * 1024)))

    w1, b1, w2, b2 = params["w1"], params["b1"], params["w2"], params["b2"]
    flops = 2 * b_pad * in_size * (in_size + out_pad)

    if cfg["resident"]:
        # Weights DMA'd once (constant index maps); grid only over batch tiles.
        cost = pl.CostEstimate(
            flops=flops,
            transcendentals=0,
            bytes_accessed=(x_bf.size * 2 + w1.size * 2 + w2.size * 2
                            + b1.size * 4 + b2.size * 4
                            + b_pad * out_pad * out_itemsize),
        )
        out_padded = pl.pallas_call(
            decoder_resident_kernel,
            out_shape=jax.ShapeDtypeStruct((b_pad, out_pad), out_dtype),
            grid_spec=pltpu.PrefetchScalarGridSpec(
                num_scalar_prefetch=0,
                grid=(n_bt,),
                in_specs=[
                    pl.BlockSpec((block_b, in_size), lambda i: (i, 0)),   # x
                    pl.BlockSpec((in_size, in_size), lambda i: (0, 0)),   # W1 (resident)
                    pl.BlockSpec((1, in_size), lambda i: (0, 0)),         # b1 (resident)
                    pl.BlockSpec((in_size, out_pad), lambda i: (0, 0)),   # W2 (resident)
                    pl.BlockSpec((1, out_pad), lambda i: (0, 0)),         # b2 (resident)
                ],
                out_specs=pl.BlockSpec((block_b, out_pad), lambda i: (i, 0)),
            ),
            compiler_params=pltpu.CompilerParams(
                dimension_semantics=("parallel",),
                vmem_limit_bytes=vmem_limit,
            ),
            cost_estimate=cost,
        )(x_bf, w1, b1, w2, b2)
    else:
        tk, tn = cfg["tk"], cfg["tn"]
        n_kt = max(1, in_size // tk)
        n_nt = max(1, out_pad // tn)
        out_is_f32 = out_dtype == jnp.float32
        scratch_shapes = [] if out_is_f32 else [pltpu.VMEM((block_b, tn),
                                                           jnp.float32)]
        kernel = functools.partial(decoder_streamed_kernel, tk=tk)
        cost = pl.CostEstimate(
            flops=flops,
            transcendentals=0,
            bytes_accessed=(x_bf.size * 2 * n_nt
                            + w1.size * 2 * n_bt * n_nt
                            + w2.size * 2 * n_bt
                            + b1.size * 4
                            + b2.size * 4 * n_bt
                            + b_pad * out_pad * out_itemsize),
        )
        out_padded = pl.pallas_call(
            kernel,
            out_shape=jax.ShapeDtypeStruct((b_pad, out_pad), out_dtype),
            grid_spec=pltpu.PrefetchScalarGridSpec(
                num_scalar_prefetch=0,
                grid=(n_bt, n_nt, n_kt),
                in_specs=[
                    pl.BlockSpec((block_b, in_size), lambda i, j, k: (i, 0)),  # x
                    pl.BlockSpec((in_size, tk), lambda i, j, k: (0, k)),       # W1 col tile
                    pl.BlockSpec((1, in_size), lambda i, j, k: (0, 0)),        # b1 resident
                    pl.BlockSpec((tk, tn), lambda i, j, k: (k, j)),            # W2 tile
                    pl.BlockSpec((1, tn), lambda i, j, k: (0, j)),             # b2 tile
                ],
                out_specs=pl.BlockSpec((block_b, tn), lambda i, j, k: (i, j)),
                scratch_shapes=scratch_shapes,
            ),
            compiler_params=pltpu.CompilerParams(
                dimension_semantics=("parallel", "parallel", "arbitrary"),
                vmem_limit_bytes=vmem_limit,
            ),
            cost_estimate=cost,
        )(x_bf, w1, b1, w2, b2)

    return out_padded[:B, :out_size]


def init_decoder_params(key, in_size, out_size, dtype=jnp.float32):
    """Deterministic init matching PyTorch Linear shapes.
    PyTorch stores weight as (out, in); we keep the transpose (in, out)."""
    k1, k2, k3, k4 = jax.random.split(key, 4)
    bound1 = 1.0 / jnp.sqrt(in_size)
    w1 = jax.random.uniform(k1, (in_size, in_size), dtype, -bound1, bound1)
    b1 = jax.random.uniform(k2, (1, in_size), dtype, -bound1, bound1)
    bound2 = 1.0 / jnp.sqrt(in_size)
    w2 = jax.random.uniform(k3, (in_size, out_size), dtype, -bound2, bound2)
    b2 = jax.random.uniform(k4, (1, out_size), dtype, -bound2, bound2)
    return w1, b1, w2, b2


if __name__ == "__main__":
    key = jax.random.PRNGKey(0)
    B, in_size, out_size = 8, 32, 16

    kx, kp = jax.random.split(key)
    x = jax.random.normal(kx, (B, in_size), jnp.float32)
    w1, b1, w2, b2 = init_decoder_params(kp, in_size, out_size)
    params = prepare_decoder_params(w1, b1, w2, b2)

    # Default path (small shapes -> weights fully VMEM-resident fast path).
    out = jax.block_until_ready(decoder_forward(x, params))
    assert out.shape == (B, out_size)

    # Also exercise the streamed (weights-not-resident) path by forcing a tiny
    # VMEM budget for the tile chooser.
    out_streamed = jax.block_until_ready(
        decoder_forward(x, params, vmem_budget_override=1))
    assert out_streamed.shape == (B, out_size)

    # Reference mimicking the kernel's bf16 matmul operands with f32 accum.
    xb = x.astype(jnp.bfloat16).astype(jnp.float32)
    w1b = w1.astype(jnp.bfloat16).astype(jnp.float32)
    w2b = w2.astype(jnp.bfloat16).astype(jnp.float32)
    h = jnp.maximum(xb @ w1b + b1, 0.0)
    ref = h.astype(jnp.bfloat16).astype(jnp.float32) @ w2b + b2
    assert jnp.allclose(out, ref, atol=1e-2, rtol=1e-2), "resident path mismatch"
    assert jnp.allclose(out_streamed, ref, atol=1e-2, rtol=1e-2), "streamed path mismatch"

    # Sanity-check against the pure-f32 PyTorch-equivalent forward as well.
    # (bf16 operands => looser tolerance; documented design choice.)
    ref_f32 = jnp.maximum(x @ w1 + b1, 0.0) @ w2 + b2
    assert jnp.allclose(out, ref_f32, atol=5e-2, rtol=5e-2), "mismatch vs f32 reference"

    print("KERNEL_OK")
</pallas_src>

<mosaic_0001>
module attributes {stable_mosaic.version = 11 : i64} {
  func.func @decoder_resident_kernel(%arg0: i32, %arg1: memref<8x32xbf16, #tpu.memory_space<vmem>>, %arg2: memref<32x32xbf16, #tpu.memory_space<vmem>>, %arg3: memref<1x32xf32, #tpu.memory_space<vmem>>, %arg4: memref<32x128xbf16, #tpu.memory_space<vmem>>, %arg5: memref<1x128xf32, #tpu.memory_space<vmem>>, %arg6: memref<8x128xf32, #tpu.memory_space<vmem>>) attributes {dimension_semantics = [#tpu.dimension_semantics<parallel>], iteration_bounds = array<i64: 1>, scalar_prefetch = 0 : i64, scratch_operands = 0 : i64, tpu.core_type = #tpu.core_type<tc>, window_params = [{transform_indices = @transform_0, window_bounds = array<i64: 8, 32>}, {pipeline_mode = #tpu.pipeline_mode<synchronous>, transform_indices = @transform_1, window_bounds = array<i64: 32, 32>}, {pipeline_mode = #tpu.pipeline_mode<synchronous>, transform_indices = @transform_2, window_bounds = array<i64: 1, 32>}, {pipeline_mode = #tpu.pipeline_mode<synchronous>, transform_indices = @transform_3, window_bounds = array<i64: 32, 128>}, {pipeline_mode = #tpu.pipeline_mode<synchronous>, transform_indices = @transform_4, window_bounds = array<i64: 1, 128>}, {transform_indices = @transform_5, window_bounds = array<i64: 8, 128>}]} {
    %c0 = arith.constant 0 : index
    %c0_0 = arith.constant 0 : index
    %0 = vector.load %arg1[%c0, %c0_0] : memref<8x32xbf16, #tpu.memory_space<vmem>>, vector<8x32xbf16>
    %c0_1 = arith.constant 0 : index
    %c0_2 = arith.constant 0 : index
    %1 = vector.load %arg2[%c0_1, %c0_2] : memref<32x32xbf16, #tpu.memory_space<vmem>>, vector<32x32xbf16>
    %cst = arith.constant dense<0.000000e+00> : vector<8x32xf32>
    %2 = tpu.matmul %0, %1, %cst {dimension_numbers = #tpu.dot_dimension_numbers<[1], [0], [0], [1], [0, 0, 1, 1], [], []>} : vector<8x32xbf16>, vector<32x32xbf16>, vector<8x32xf32> -> vector<8x32xf32>
    %c0_3 = arith.constant 0 : index
    %c0_4 = arith.constant 0 : index
    %3 = vector.load %arg3[%c0_3, %c0_4] : memref<1x32xf32, #tpu.memory_space<vmem>>, vector<1x32xf32>
    %4 = vector.broadcast %3 : vector<1x32xf32> to vector<8x32xf32>
    %5 = arith.addf %2, %4 : vector<8x32xf32>
    %cst_5 = arith.constant 0.000000e+00 : f32
    %6 = vector.broadcast %cst_5 : f32 to vector<8x32xf32>
    %7 = arith.maximumf %5, %6 : vector<8x32xf32>
    %8 = arith.truncf %7 : vector<8x32xf32> to vector<8x32xbf16>
    %c0_6 = arith.constant 0 : index
    %c0_7 = arith.constant 0 : index
    %9 = vector.load %arg4[%c0_6, %c0_7] : memref<32x128xbf16, #tpu.memory_space<vmem>>, vector<32x128xbf16>
    %cst_8 = arith.constant dense<0.000000e+00> : vector<8x128xf32>
    %10 = tpu.matmul %8, %9, %cst_8 {dimension_numbers = #tpu.dot_dimension_numbers<[1], [0], [0], [1], [0, 0, 1, 1], [], []>} : vector<8x32xbf16>, vector<32x128xbf16>, vector<8x128xf32> -> vector<8x128xf32>
    %c0_9 = arith.constant 0 : index
    %c0_10 = arith.constant 0 : index
    %11 = vector.load %arg5[%c0_9, %c0_10] : memref<1x128xf32, #tpu.memory_space<vmem>>, vector<1x128xf32>
    %12 = vector.broadcast %11 : vector<1x128xf32> to vector<8x128xf32>
    %13 = arith.addf %10, %12 : vector<8x128xf32>
    %c0_11 = arith.constant 0 : index
    %c0_12 = arith.constant 0 : index
    %14 = vector.load %arg6[%c0_11, %c0_12] : memref<8x128xf32, #tpu.memory_space<vmem>>, vector<8x128xf32>
    tpu.vector_store %arg6[%c0_11, %c0_12], %13 {strides = array<i32>} : memref<8x128xf32, #tpu.memory_space<vmem>>, vector<8x128xf32>,
    return
  }
  func.func @transform_0(%arg0: i32) -> (i32, i32) {
    %c0_i32 = arith.constant 0 : i32
    %c0_i32_0 = arith.constant 0 : i32
    return %arg0, %c0_i32 : i32, i32
  }
  func.func @transform_1(%arg0: i32) -> (i32, i32) {
    %c0_i32 = arith.constant 0 : i32
    %c0_i32_0 = arith.constant 0 : i32
    %c0_i32_1 = arith.constant 0 : i32
    return %c0_i32, %c0_i32_0 : i32, i32
  }
  func.func @transform_2(%arg0: i32) -> (i32, i32) {
    %c0_i32 = arith.constant 0 : i32
    %c0_i32_0 = arith.constant 0 : i32
    %c0_i32_1 = arith.constant 0 : i32
    return %c0_i32, %c0_i32_0 : i32, i32
  }
  func.func @transform_3(%arg0: i32) -> (i32, i32) {
    %c0_i32 = arith.constant 0 : i32
    %c0_i32_0 = arith.constant 0 : i32
    %c0_i32_1 = arith.constant 0 : i32
    return %c0_i32, %c0_i32_0 : i32, i32
  }
  func.func @transform_4(%arg0: i32) -> (i32, i32) {
    %c0_i32 = arith.constant 0 : i32
    %c0_i32_0 = arith.constant 0 : i32
    %c0_i32_1 = arith.constant 0 : i32
    return %c0_i32, %c0_i32_0 : i32, i32
  }
  func.func @transform_5(%arg0: i32) -> (i32, i32) {
    %c0_i32 = arith.constant 0 : i32
    %c0_i32_0 = arith.constant 0 : i32
    return %arg0, %c0_i32 : i32, i32
  }
}

</mosaic_0001>

<bundles_post_ra>
// kernel: tpu_custom_call.1
= control target key start
LH: loop header
LB: loop body
LE: loop exit
PB: predicated region body
PF: predicated region fallthrough
CT: control target
= control target key end

     0   :  { %10 = vsyncpa [#allocation3], 0  ;;  %s448_s0 = inlined_call_operand.hbm [shape: bf16[8,32], index: 0, kind: input, shape index: {}]   ;;  %s449_s1 = inlined_call_operand.hbm [shape: bf16[32,32], index: 1, kind: input, shape index: {}]   ;;  %s450_s2 = inlined_call_operand.vmem [shape: f32[1,32], index: 2, kind: input, shape index: {}]   ;;  %s451_s3 = inlined_call_operand.hbm [shape: bf16[32,128], index: 3, kind: input, shape index: {}]   ;;  %s452_s4 = inlined_call_operand.vmem [shape: f32[1,128], index: 4, kind: input, shape index: {}]   ;;  %s453_s5 = inlined_call_operand.hbm [shape: f32[8,128], index: 5, kind: output, shape index: {}]  }
   0x1   :  { %11 = vsyncpa [#allocation6], 0 }
   0x2   :  { %12 = vsyncpa [#allocation4], 0  ;;  %s350_s18 = smov [#allocation5]   ;;  %s256_s22 = scalar_lea.hbm %s449_s1, 256 }
   0x3   :  { %s28_s19 = sshll.u32 %s350_s18, 4  ;;  %p257_p0 = scmp.ne.s32.totalorder %s449_s1, %s256_s22  ;;  %s29_s19 = int_to_ptr.vmem [resolvable:$true] %s28_s19 }
   0x4   :  { %p260_p1 = scmp.lt.u32.totalorder %s256_s22, %s449_s1 }
   0x6   :  { %p262_p2 = pnand %p260_p1, %p257_p0 }
   0x8   :  { %265 = shalt.err (!%p262_p2)
}
   0x9   :  { %s266_s27 = scalar_lea.vmem %s29_s19, 256  ;;  %p271_p4 = scmp.lt.s32.totalorder %s29_s19, %s29_s19 }
   0xa   :  { %p267_p3 = scmp.ne.s32.totalorder %s29_s19, %s266_s27  ;;  %p272_p5 = scmp.lt.s32.totalorder %s266_s27, %s266_s27 }
   0xc   :  { %p273_p6 = por %p272_p5, %p271_p4 }
   0xe   :  { %p274_p7 = pnand %p273_p6, %p267_p3 }
  0x10   :  { %277 = shalt.err (!%p274_p7)
}
  0x11   :  { %s351_s28 = smov 64   ;;  %s352_s29 = smov 4  }
  0x12   :  { %34 = dma.hbm_to_vmem [thread:$0]  %s449_s1, 256, %s29_s19, [#allocation6], %s351_s28, %s351_s28, %s352_s29  }
  0x13   :  { %s353_s7 = smov [#allocation2]   ;;  %s354_s9 = smov [#allocation7]  }
  0x14   :  { %s19_s8 = sshll.u32 %s353_s7, 4  ;;  %s42_s10 = sshll.u32 %s354_s9, 4  ;;  %s20_s8 = int_to_ptr.vmem [resolvable:$true] %s19_s8  ;;  %s43_s10 = int_to_ptr.vmem [resolvable:$true] %s42_s10 }
  0x15   :  { %s278_s13 = scalar_lea.hbm %s448_s0, 64 }
  0x16   :  { %p279_p8 = scmp.ne.s32.totalorder %s448_s0, %s278_s13  ;;  %p282_p9 = scmp.lt.u32.totalorder %s278_s13, %s448_s0 }
  0x18   :  { %p284_p10 = pnand %p282_p9, %p279_p8 }
  0x1a   :  { %287 = shalt.err (!%p284_p10)
}
  0x1b   :  { %s288_s1 = scalar_lea.vmem %s20_s8, 64  ;;  %p293_p12 = scmp.lt.s32.totalorder %s20_s8, %s20_s8 }
  0x1c   :  { %p289_p11 = scmp.ne.s32.totalorder %s20_s8, %s288_s1  ;;  %p294_p13 = scmp.lt.s32.totalorder %s288_s1, %s288_s1 }
  0x1e   :  { %p295_p0 = por %p294_p13, %p293_p12 }
  0x20   :  { %p296_p1 = pnand %p295_p0, %p289_p11 }
  0x22   :  { %299 = shalt.err (!%p296_p1)
}
  0x23   :  { %22 = dma.hbm_to_vmem [thread:$0]  %s448_s0, 64, %s20_s8, [#allocation3]  }
  0x24   :  { %s300_s22 = scalar_lea.hbm %s451_s3, 256 }
  0x25   :  { %p301_p2 = scmp.ne.s32.totalorder %s451_s3, %s300_s22  ;;  %p304_p3 = scmp.lt.u32.totalorder %s300_s22, %s451_s3 }
  0x27   :  { %p306_p4 = pnand %p304_p3, %p301_p2 }
  0x29   :  { %309 = shalt.err (!%p306_p4)
}
  0x2a   :  { %s310_s27 = scalar_lea.vmem %s43_s10, 256  ;;  %p315_p6 = scmp.lt.s32.totalorder %s43_s10, %s43_s10 }
  0x2b   :  { %p311_p5 = scmp.ne.s32.totalorder %s43_s10, %s310_s27  ;;  %p316_p7 = scmp.lt.s32.totalorder %s310_s27, %s310_s27 }
  0x2d   :  { %p317_p8 = por %p316_p7, %p315_p6 }
  0x2f   :  { %p318_p9 = pnand %p317_p8, %p311_p5 }
  0x31   :  { %321 = shalt.err (!%p318_p9)
}
  0x32   :  { %48 = dma.hbm_to_vmem [thread:$0]  %s451_s3, 256, %s43_s10, [#allocation6], %s351_s28, %s351_s28, %s352_s29  }
  0x33   :  { %344 = dma.done.wait [#allocation3], 64  }
  0x34   :  { %345 = vsyncadd [#allocation3], 4294967232 }
  0x35   :  { %346 = dma.done.wait [#allocation6], 512  }
  0x36   :  { %347 = vsyncadd [#allocation6], 4294966784  ;;  %v355_v0 = vmov 0.0   ;;  %vm356_vm0 = vmmov 0   ;;  %v252_v1 = vld [vmem:[#allocation5] sm:$0xff]   ;;  %v253_v2 = vld [vmem:[#allocation5 + $0x8] sm:$0xff]  }
  0x37   :  { %228 = vmatprep.subr.bf16.mxu0 %v355_v0  ;;  %232 = vmatprep.mubr.msk.bf16.mxu0 %vm356_vm0, %v355_v0  ;;  %v61_v3 = vld [vmem:[#allocation2] sm:$0xf]  ;;  %vm85_vm1 = vcmask 261120   ;;  %v254_v4 = vld [vmem:[#allocation7] sm:$0xff]   ;;  %s357_s7 = smov [#allocation8]  }
  0x38   :  { %236 = vmatprep.subr.bf16.mxu1 %v355_v0  ;;  %240 = vmatprep.mubr.msk.bf16.mxu1 %vm356_vm0, %v355_v0  ;;  %v255_v5 = vld [vmem:[#allocation7 + $0x8] sm:$0xff]   ;;  %s204_s8 = sshll.u32 %s357_s7, 4  ;;  %s205_s8 = int_to_ptr.vmem [resolvable:$true] %s204_s8 }
  0x39   :  { %229 = vmatpush3.bf16.msra.mxu0 %v252_v1  ;;  %237 = vmatpush3.bf16.msra.mxu1 %v254_v4  ;;  %v214_v6 = vld [vmem:[%s450_s2] ss:$0 sm:$0xff]  ;;  %s322_s2 = scalar_lea.vmem %s205_s8, 128  ;;  %p327_p11 = scmp.lt.s32.totalorder %s205_s8, %s205_s8 }
  0x3a   :  { %230 = vmatprep.subr.bf16.mxu0 %v355_v0  ;;  %238 = vmatprep.subr.bf16.mxu1 %v355_v0  ;;  %v218_v14 = vld [vmem:[%s452_s4] ss:$0 sm:$0xff]  ;;  %p323_p10 = scmp.ne.s32.totalorder %s205_s8, %s322_s2  ;;  %p328_p12 = scmp.lt.s32.totalorder %s322_s2, %s322_s2 }
  0x3c   :  { %p329_p13 = por %p328_p12, %p327_p11 }
  0x3d   :  { %231 = vmatpush3.bf16.msra.mxu0 %v253_v2  ;;  %239 = vmatpush3.bf16.msra.mxu1 %v255_v5 }
  0x3e   :  { %p330_p0 = pnand %p329_p13, %p323_p10 }
  0x40   :  { %233 = vmatmul.mubr.msk.bf16.vlgmr.msra.gmra.mrb[0].mxu0 %vm85_vm1, %v61_v3 }
 0x113   :  { %v123_v7 = vpop.f32.mrb[0].mxu0 }
 0x114   :  { %v124_v8 = vadd.f32 %v214_v6, %v123_v7  ;;  %v234_v9 = vpop.f32.mrb[1].mxu0 }
 0x115   :  { %v126_v10 = vpop.f32.mrb[2].mxu0 }
 0x116   :  { %v129_v11 = vmax.f32 %v124_v8, 0.0  ;;  %v235_v12 = vpop.f32.mrb[3].mxu0 }
 0x118   :  { %v130_v13 = vpack.c.bf16 %v129_v11, %v129_v11 }
 0x11a   :  { %241 = vmatmul.mubr.msk.bf16.vlgmr.msra.gmra.mrb[0].mxu1 %vm85_vm1, %v130_v13 }
 0x1ed   :  { %v191_v15 = vpop.f32.mrb[0].mxu1 }
 0x1ee   :  { %v192_v16 = vadd.f32 %v218_v14, %v191_v15  ;;  %v242_v17 = vpop.f32.mrb[1].mxu1 }
 0x1ef   :  { %v194_v18 = vpop.f32.mrb[2].mxu1 }
 0x1f0   :  { %197 = vst [vmem:[#allocation8] sm:$0xff] %v192_v16  ;;  %v243_v19 = vpop.f32.mrb[3].mxu1 }
 0x1f1   :  { %333 = shalt.err (!%p330_p0)
}
 0x1f2   :  { %s334_s4 = scalar_lea.hbm %s453_s5, 128 }
 0x1f3   :  { %p335_p1 = scmp.ne.s32.totalorder %s453_s5, %s334_s4  ;;  %p338_p2 = scmp.lt.u32.totalorder %s334_s4, %s453_s5 }
 0x1f5   :  { %p340_p3 = pnand %p338_p2, %p335_p1 }
 0x1f7   :  { %343 = shalt.err (!%p340_p3)
}
 0x1f8   :  { %207 = dma.vmem_to_hbm [thread:$0]  %s205_s8, 128, %s453_s5, [#allocation4]  }
 0x1f9   :  { %348 = dma.done.wait [#allocation4], 128  }
 0x1fa   :  { %349 = vsyncadd [#allocation4], 4294967168 }
 0x1fb   :  { %211 = vsyncpa [#allocation3], 1 }
 0x1fc   :  { %212 = vsyncpa [#allocation6], 1 }
 0x1fd   :  { %213 = vsyncpa [#allocation4], 1 }

</bundles_post_ra>
